<compile_context>
chip_gen: v6e
topology: v6e:2x2x1
jax: 0.10.0
libtpu: 0.0.40
codegen_flags: <defaults>
</compile_context>

<pallas_src>
import functools

import jax
import jax.numpy as jnp
from jax import lax
from jax.experimental import pallas as pl
from jax.experimental.pallas import tpu as pltpu


def _mha_kernel(scale, n_heads, d_k, d_v,
                x_ref,                       # [1, L, d_model]
                wq_ref, bq_ref,              # [d_model, H*d_k], [1, H*d_k]
                wk_ref, bk_ref,              # [d_model, H*d_k], [1, H*d_k]
                wv_ref, bv_ref,              # [d_model, H*d_v], [1, H*d_v]
                wo_ref, bo_ref,              # [H*d_v, d_model], [1, d_model]
                out_ref,                     # [1, L, d_model]
                attn_ref):                   # [1, H, L, L]
    x = x_ref[0]                                                      # [L, d_model]

    # Fused Q/K/V projections across all heads (one big matmul each).
    # Softmax scale is folded into q.
    q_all = (jnp.dot(x, wq_ref[...], preferred_element_type=jnp.float32)
             + bq_ref[...]) * scale                                   # [L, H*d_k]
    k_all = jnp.dot(x, wk_ref[...], preferred_element_type=jnp.float32) + bk_ref[...]
    v_all = jnp.dot(x, wv_ref[...], preferred_element_type=jnp.float32) + bv_ref[...]

    # Per-head scaled dot-product attention (static unroll over heads).
    ctxs = []
    for h in range(n_heads):
        q_h = q_all[:, h * d_k:(h + 1) * d_k]                         # [L, d_k]
        k_h = k_all[:, h * d_k:(h + 1) * d_k]                         # [L, d_k]
        v_h = v_all[:, h * d_v:(h + 1) * d_v]                         # [L, d_v]

        # q @ k^T without an explicit transpose: contract last axes.
        scores = lax.dot_general(q_h, k_h, (((1,), (1,)), ((), ())),
                                 preferred_element_type=jnp.float32)  # [L, L]

        # Numerically-stable softmax over keys; divide via EUP reciprocal.
        m = jnp.max(scores, axis=-1, keepdims=True)
        e = jnp.exp(scores - m)
        inv = pl.reciprocal(jnp.sum(e, axis=-1, keepdims=True), approx=True)
        attn = e * inv
        # attn_dropout = 0.0 -> identity.

        attn_ref[0, h] = attn.astype(attn_ref.dtype)

        ctxs.append(jnp.dot(attn, v_h, preferred_element_type=jnp.float32))  # [L, d_v]

    # Concatenate head contexts and apply the output projection once
    # (full-K contraction: [L, H*d_v] @ [H*d_v, d_model]).
    ctx = jnp.concatenate(ctxs, axis=-1)                               # [L, H*d_v]
    out = jnp.dot(ctx, wo_ref[...], preferred_element_type=jnp.float32) + bo_ref[...]
    # proj_dropout = 0.0 -> identity.
    out_ref[0] = out.astype(out_ref.dtype)


def multihead_attention(Q, params, n_heads):
    """Pallas implementation of _MultiheadAttention.forward(Q) (self-attention)."""
    bs, L, d_model = Q.shape
    hdk = params["wq"].shape[-1]
    hdv = params["wv"].shape[-1]
    d_k = hdk // n_heads
    d_v = hdv // n_heads
    head_dim = d_model // n_heads
    scale = float(head_dim) ** -0.5   # nn.Parameter(head_dim**-0.5), lsa=False

    kernel = functools.partial(_mha_kernel, scale, n_heads, d_k, d_v)

    grid = (bs,)

    in_specs = [
        pl.BlockSpec((1, L, d_model), lambda b: (b, 0, 0)),   # x (per batch)
        # Weights / biases: constant block index -> resident in VMEM.
        pl.BlockSpec((d_model, hdk), lambda b: (0, 0)),       # wq
        pl.BlockSpec((1, hdk), lambda b: (0, 0)),             # bq
        pl.BlockSpec((d_model, hdk), lambda b: (0, 0)),       # wk
        pl.BlockSpec((1, hdk), lambda b: (0, 0)),             # bk
        pl.BlockSpec((d_model, hdv), lambda b: (0, 0)),       # wv
        pl.BlockSpec((1, hdv), lambda b: (0, 0)),             # bv
        pl.BlockSpec((hdv, d_model), lambda b: (0, 0)),       # wo
        pl.BlockSpec((1, d_model), lambda b: (0, 0)),         # bo
    ]
    out_specs = [
        pl.BlockSpec((1, L, d_model), lambda b: (b, 0, 0)),           # output
        pl.BlockSpec((1, n_heads, L, L), lambda b: (b, 0, 0, 0)),     # attn weights
    ]
    out_shape = [
        jax.ShapeDtypeStruct((bs, L, d_model), jnp.float32),
        jax.ShapeDtypeStruct((bs, n_heads, L, L), jnp.float32),
    ]

    out, attn = pl.pallas_call(
        kernel,
        grid=grid,
        in_specs=in_specs,
        out_specs=out_specs,
        out_shape=out_shape,
        compiler_params=pltpu.CompilerParams(
            dimension_semantics=("parallel",)),
    )(Q,
      params["wq"], params["bq"],
      params["wk"], params["bk"],
      params["wv"], params["bv"],
      params["wo"], params["bo"])
    return out, attn


def reference_mha(Q, params, n_heads):
    """Pure-JAX reference mirroring the PyTorch module exactly."""
    bs, L, d_model = Q.shape
    d_k = params["wq"].shape[-1] // n_heads
    d_v = params["wv"].shape[-1] // n_heads
    head_dim = d_model // n_heads
    scale = float(head_dim) ** -0.5

    q = (Q @ params["wq"] + params["bq"]).reshape(bs, L, n_heads, d_k).transpose(0, 2, 1, 3)
    k = (Q @ params["wk"] + params["bk"]).reshape(bs, L, n_heads, d_k).transpose(0, 2, 1, 3)
    v = (Q @ params["wv"] + params["bv"]).reshape(bs, L, n_heads, d_v).transpose(0, 2, 1, 3)

    scores = jnp.einsum("bhqd,bhkd->bhqk", q, k) * scale
    attn = jax.nn.softmax(scores, axis=-1)
    ctx = jnp.einsum("bhqk,bhkv->bhqv", attn, v)                       # [bs, h, L, d_v]
    ctx = ctx.transpose(0, 2, 1, 3).reshape(bs, L, n_heads * d_v)      # concat heads
    out = ctx @ params["wo"] + params["bo"]
    return out, attn


def init_params(key, d_model, n_heads, d_k, d_v):
    ks = jax.random.split(key, 8)
    s = 0.1
    # Fused-head layout (same as nn.Linear(d_model, n_heads*d_k), x @ W form):
    # output feature index = h * d_k + i, matching the PyTorch .view(..., n_heads, d_k).
    return {
        "wq": s * jax.random.normal(ks[0], (d_model, n_heads * d_k), jnp.float32),
        "bq": s * jax.random.normal(ks[1], (1, n_heads * d_k), jnp.float32),
        "wk": s * jax.random.normal(ks[2], (d_model, n_heads * d_k), jnp.float32),
        "bk": s * jax.random.normal(ks[3], (1, n_heads * d_k), jnp.float32),
        "wv": s * jax.random.normal(ks[4], (d_model, n_heads * d_v), jnp.float32),
        "bv": s * jax.random.normal(ks[5], (1, n_heads * d_v), jnp.float32),
        "wo": s * jax.random.normal(ks[6], (n_heads * d_v, d_model), jnp.float32),
        "bo": s * jax.random.normal(ks[7], (1, d_model), jnp.float32),
    }


if __name__ == "__main__":
    bs, L, d_model, n_heads = 2, 8, 32, 4
    d_k = d_v = d_model // n_heads

    key = jax.random.PRNGKey(0)
    kq, kp = jax.random.split(key)
    Q = jax.random.normal(kq, (bs, L, d_model), jnp.float32)
    params = init_params(kp, d_model, n_heads, d_k, d_v)

    out, attn = multihead_attention(Q, params, n_heads)
    out = jax.block_until_ready(out)
    attn = jax.block_until_ready(attn)

    ref_out, ref_attn = reference_mha(Q, params, n_heads)
    # Tolerances account for the EUP approx-reciprocal used in the softmax.
    assert jnp.allclose(out, ref_out, atol=2e-3, rtol=2e-3), "output mismatch"
    assert jnp.allclose(attn, ref_attn, atol=2e-3, rtol=2e-3), "attn mismatch"

    print("KERNEL_OK")
</pallas_src>

<mosaic_0001>
module attributes {stable_mosaic.version = 11 : i64} {
  func.func @_mha_kernel(%arg0: i32, %arg1: memref<1x8x32xf32, #tpu.memory_space<vmem>>, %arg2: memref<32x32xf32, #tpu.memory_space<vmem>>, %arg3: memref<1x32xf32, #tpu.memory_space<vmem>>, %arg4: memref<32x32xf32, #tpu.memory_space<vmem>>, %arg5: memref<1x32xf32, #tpu.memory_space<vmem>>, %arg6: memref<32x32xf32, #tpu.memory_space<vmem>>, %arg7: memref<1x32xf32, #tpu.memory_space<vmem>>, %arg8: memref<32x32xf32, #tpu.memory_space<vmem>>, %arg9: memref<1x32xf32, #tpu.memory_space<vmem>>, %arg10: memref<1x8x32xf32, #tpu.memory_space<vmem>>, %arg11: memref<1x4x8x8xf32, #tpu.memory_space<vmem>>) attributes {dimension_semantics = [#tpu.dimension_semantics<parallel>], iteration_bounds = array<i64: 2>, scalar_prefetch = 0 : i64, scratch_operands = 0 : i64, tpu.core_type = #tpu.core_type<tc>, window_params = [{transform_indices = @transform_0, window_bounds = array<i64: 1, 8, 32>}, {pipeline_mode = #tpu.pipeline_mode<synchronous>, transform_indices = @transform_1, window_bounds = array<i64: 32, 32>}, {pipeline_mode = #tpu.pipeline_mode<synchronous>, transform_indices = @transform_2, window_bounds = array<i64: 1, 32>}, {pipeline_mode = #tpu.pipeline_mode<synchronous>, transform_indices = @transform_3, window_bounds = array<i64: 32, 32>}, {pipeline_mode = #tpu.pipeline_mode<synchronous>, transform_indices = @transform_4, window_bounds = array<i64: 1, 32>}, {pipeline_mode = #tpu.pipeline_mode<synchronous>, transform_indices = @transform_5, window_bounds = array<i64: 32, 32>}, {pipeline_mode = #tpu.pipeline_mode<synchronous>, transform_indices = @transform_6, window_bounds = array<i64: 1, 32>}, {pipeline_mode = #tpu.pipeline_mode<synchronous>, transform_indices = @transform_7, window_bounds = array<i64: 32, 32>}, {pipeline_mode = #tpu.pipeline_mode<synchronous>, transform_indices = @transform_8, window_bounds = array<i64: 1, 32>}, {transform_indices = @transform_9, window_bounds = array<i64: 1, 8, 32>}, {transform_indices = @transform_10, window_bounds = array<i64: 1, 4, 8, 8>}]} {
    %c0 = arith.constant 0 : index
    %c0_0 = arith.constant 0 : index
    %c0_1 = arith.constant 0 : index
    %0 = vector.load %arg1[%c0, %c0_0, %c0_1] : memref<1x8x32xf32, #tpu.memory_space<vmem>>, vector<1x8x32xf32>
    %1 = vector.shape_cast %0 : vector<1x8x32xf32> to vector<8x32xf32>
    %c0_2 = arith.constant 0 : index
    %c0_3 = arith.constant 0 : index
    %2 = vector.load %arg2[%c0_2, %c0_3] : memref<32x32xf32, #tpu.memory_space<vmem>>, vector<32x32xf32>
    %cst = arith.constant dense<0.000000e+00> : vector<8x32xf32>
    %3 = tpu.matmul %1, %2, %cst {dimension_numbers = #tpu.dot_dimension_numbers<[1], [0], [0], [1], [0, 0, 1, 1], [], []>} : vector<8x32xf32>, vector<32x32xf32>, vector<8x32xf32> -> vector<8x32xf32>
    %c0_4 = arith.constant 0 : index
    %c0_5 = arith.constant 0 : index
    %4 = vector.load %arg3[%c0_4, %c0_5] : memref<1x32xf32, #tpu.memory_space<vmem>>, vector<1x32xf32>
    %5 = vector.broadcast %4 : vector<1x32xf32> to vector<8x32xf32>
    %6 = arith.addf %3, %5 : vector<8x32xf32>
    %cst_6 = arith.constant 0.353553385 : f32
    %7 = vector.broadcast %cst_6 : f32 to vector<8x32xf32>
    %8 = arith.mulf %6, %7 : vector<8x32xf32>
    %c0_7 = arith.constant 0 : index
    %c0_8 = arith.constant 0 : index
    %9 = vector.load %arg4[%c0_7, %c0_8] : memref<32x32xf32, #tpu.memory_space<vmem>>, vector<32x32xf32>
    %cst_9 = arith.constant dense<0.000000e+00> : vector<8x32xf32>
    %10 = tpu.matmul %1, %9, %cst_9 {dimension_numbers = #tpu.dot_dimension_numbers<[1], [0], [0], [1], [0, 0, 1, 1], [], []>} : vector<8x32xf32>, vector<32x32xf32>, vector<8x32xf32> -> vector<8x32xf32>
    %c0_10 = arith.constant 0 : index
    %c0_11 = arith.constant 0 : index
    %11 = vector.load %arg5[%c0_10, %c0_11] : memref<1x32xf32, #tpu.memory_space<vmem>>, vector<1x32xf32>
    %12 = vector.broadcast %11 : vector<1x32xf32> to vector<8x32xf32>
    %13 = arith.addf %10, %12 : vector<8x32xf32>
    %c0_12 = arith.constant 0 : index
    %c0_13 = arith.constant 0 : index
    %14 = vector.load %arg6[%c0_12, %c0_13] : memref<32x32xf32, #tpu.memory_space<vmem>>, vector<32x32xf32>
    %cst_14 = arith.constant dense<0.000000e+00> : vector<8x32xf32>
    %15 = tpu.matmul %1, %14, %cst_14 {dimension_numbers = #tpu.dot_dimension_numbers<[1], [0], [0], [1], [0, 0, 1, 1], [], []>} : vector<8x32xf32>, vector<32x32xf32>, vector<8x32xf32> -> vector<8x32xf32>
    %c0_15 = arith.constant 0 : index
    %c0_16 = arith.constant 0 : index
    %16 = vector.load %arg7[%c0_15, %c0_16] : memref<1x32xf32, #tpu.memory_space<vmem>>, vector<1x32xf32>
    %17 = vector.broadcast %16 : vector<1x32xf32> to vector<8x32xf32>
    %18 = arith.addf %15, %17 : vector<8x32xf32>
    %19 = vector.extract_strided_slice %8 {offsets = [0, 0], sizes = [8, 8], strides = [1, 1]} : vector<8x32xf32> to vector<8x8xf32>
    %20 = vector.extract_strided_slice %13 {offsets = [0, 0], sizes = [8, 8], strides = [1, 1]} : vector<8x32xf32> to vector<8x8xf32>
    %21 = vector.extract_strided_slice %18 {offsets = [0, 0], sizes = [8, 8], strides = [1, 1]} : vector<8x32xf32> to vector<8x8xf32>
    %cst_17 = arith.constant dense<0.000000e+00> : vector<8x8xf32>
    %22 = tpu.matmul %19, %20, %cst_17 {dimension_numbers = #tpu.dot_dimension_numbers<[1], [1], [0], [0], [0, 0, 1, 0], [], []>} : vector<8x8xf32>, vector<8x8xf32>, vector<8x8xf32> -> vector<8x8xf32>
    %cst_18 = arith.constant dense<0xFF800000> : vector<8xf32>
    %23 = vector.multi_reduction <maximumf>, %22, %cst_18 [1] : vector<8x8xf32> to vector<8xf32>
    %24 = vector.shape_cast %23 : vector<8xf32> to vector<8x1xf32>
    %25 = vector.broadcast %24 : vector<8x1xf32> to vector<8x8xf32>
    %26 = arith.subf %22, %25 : vector<8x8xf32>
    %27 = math.exp %26 : vector<8x8xf32>
    %cst_19 = arith.constant dense<0.000000e+00> : vector<8xf32>
    %28 = vector.multi_reduction <add>, %27, %cst_19 [1] : vector<8x8xf32> to vector<8xf32>
    %29 = vector.shape_cast %28 : vector<8xf32> to vector<8x1xf32>
    %30 = tpu.reciprocal %29 {approx = true} : vector<8x1xf32> -> vector<8x1xf32>
    %31 = vector.broadcast %30 : vector<8x1xf32> to vector<8x8xf32>
    %32 = arith.mulf %27, %31 : vector<8x8xf32>
    %c0_20 = arith.constant 0 : index
    %c0_21 = arith.constant 0 : index
    %c0_22 = arith.constant 0 : index
    %c0_23 = arith.constant 0 : index
    %33 = vector.load %arg11[%c0_20, %c0_21, %c0_22, %c0_23] : memref<1x4x8x8xf32, #tpu.memory_space<vmem>>, vector<1x1x8x8xf32>
    %34 = vector.shape_cast %33 : vector<1x1x8x8xf32> to vector<8x8xf32>
    %35 = vector.shape_cast %32 : vector<8x8xf32> to vector<1x1x8x8xf32>
    tpu.vector_store %arg11[%c0_20, %c0_21, %c0_22, %c0_23], %35 {strides = array<i32>} : memref<1x4x8x8xf32, #tpu.memory_space<vmem>>, vector<1x1x8x8xf32>,
    %cst_24 = arith.constant dense<0.000000e+00> : vector<8x8xf32>
    %36 = tpu.matmul %32, %21, %cst_24 {dimension_numbers = #tpu.dot_dimension_numbers<[1], [0], [0], [1], [0, 0, 1, 1], [], []>} : vector<8x8xf32>, vector<8x8xf32>, vector<8x8xf32> -> vector<8x8xf32>
    %37 = vector.extract_strided_slice %8 {offsets = [0, 8], sizes = [8, 8], strides = [1, 1]} : vector<8x32xf32> to vector<8x8xf32>
    %38 = vector.extract_strided_slice %13 {offsets = [0, 8], sizes = [8, 8], strides = [1, 1]} : vector<8x32xf32> to vector<8x8xf32>
    %39 = vector.extract_strided_slice %18 {offsets = [0, 8], sizes = [8, 8], strides = [1, 1]} : vector<8x32xf32> to vector<8x8xf32>
    %cst_25 = arith.constant dense<0.000000e+00> : vector<8x8xf32>
    %40 = tpu.matmul %37, %38, %cst_25 {dimension_numbers = #tpu.dot_dimension_numbers<[1], [1], [0], [0], [0, 0, 1, 0], [], []>} : vector<8x8xf32>, vector<8x8xf32>, vector<8x8xf32> -> vector<8x8xf32>
    %cst_26 = arith.constant dense<0xFF800000> : vector<8xf32>
    %41 = vector.multi_reduction <maximumf>, %40, %cst_26 [1] : vector<8x8xf32> to vector<8xf32>
    %42 = vector.shape_cast %41 : vector<8xf32> to vector<8x1xf32>
    %43 = vector.broadcast %42 : vector<8x1xf32> to vector<8x8xf32>
    %44 = arith.subf %40, %43 : vector<8x8xf32>
    %45 = math.exp %44 : vector<8x8xf32>
    %cst_27 = arith.constant dense<0.000000e+00> : vector<8xf32>
    %46 = vector.multi_reduction <add>, %45, %cst_27 [1] : vector<8x8xf32> to vector<8xf32>
    %47 = vector.shape_cast %46 : vector<8xf32> to vector<8x1xf32>
    %48 = tpu.reciprocal %47 {approx = true} : vector<8x1xf32> -> vector<8x1xf32>
    %49 = vector.broadcast %48 : vector<8x1xf32> to vector<8x8xf32>
    %50 = arith.mulf %45, %49 : vector<8x8xf32>
    %c0_28 = arith.constant 0 : index
    %c1 = arith.constant 1 : index
    %c0_29 = arith.constant 0 : index
    %c0_30 = arith.constant 0 : index
    %51 = vector.load %arg11[%c0_28, %c1, %c0_29, %c0_30] : memref<1x4x8x8xf32, #tpu.memory_space<vmem>>, vector<1x1x8x8xf32>
    %52 = vector.shape_cast %51 : vector<1x1x8x8xf32> to vector<8x8xf32>
    %53 = vector.shape_cast %50 : vector<8x8xf32> to vector<1x1x8x8xf32>
    tpu.vector_store %arg11[%c0_28, %c1, %c0_29, %c0_30], %53 {strides = array<i32>} : memref<1x4x8x8xf32, #tpu.memory_space<vmem>>, vector<1x1x8x8xf32>,
    %cst_31 = arith.constant dense<0.000000e+00> : vector<8x8xf32>
    %54 = tpu.matmul %50, %39, %cst_31 {dimension_numbers = #tpu.dot_dimension_numbers<[1], [0], [0], [1], [0, 0, 1, 1], [], []>} : vector<8x8xf32>, vector<8x8xf32>, vector<8x8xf32> -> vector<8x8xf32>
    %55 = vector.extract_strided_slice %8 {offsets = [0, 16], sizes = [8, 8], strides = [1, 1]} : vector<8x32xf32> to vector<8x8xf32>
    %56 = vector.extract_strided_slice %13 {offsets = [0, 16], sizes = [8, 8], strides = [1, 1]} : vector<8x32xf32> to vector<8x8xf32>
    %57 = vector.extract_strided_slice %18 {offsets = [0, 16], sizes = [8, 8], strides = [1, 1]} : vector<8x32xf32> to vector<8x8xf32>
    %cst_32 = arith.constant dense<0.000000e+00> : vector<8x8xf32>
    %58 = tpu.matmul %55, %56, %cst_32 {dimension_numbers = #tpu.dot_dimension_numbers<[1], [1], [0], [0], [0, 0, 1, 0], [], []>} : vector<8x8xf32>, vector<8x8xf32>, vector<8x8xf32> -> vector<8x8xf32>
    %cst_33 = arith.constant dense<0xFF800000> : vector<8xf32>
    %59 = vector.multi_reduction <maximumf>, %58, %cst_33 [1] : vector<8x8xf32> to vector<8xf32>
    %60 = vector.shape_cast %59 : vector<8xf32> to vector<8x1xf32>
    %61 = vector.broadcast %60 : vector<8x1xf32> to vector<8x8xf32>
    %62 = arith.subf %58, %61 : vector<8x8xf32>
    %63 = math.exp %62 : vector<8x8xf32>
    %cst_34 = arith.constant dense<0.000000e+00> : vector<8xf32>
    %64 = vector.multi_reduction <add>, %63, %cst_34 [1] : vector<8x8xf32> to vector<8xf32>
    %65 = vector.shape_cast %64 : vector<8xf32> to vector<8x1xf32>
    %66 = tpu.reciprocal %65 {approx = true} : vector<8x1xf32> -> vector<8x1xf32>
    %67 = vector.broadcast %66 : vector<8x1xf32> to vector<8x8xf32>
    %68 = arith.mulf %63, %67 : vector<8x8xf32>
    %c0_35 = arith.constant 0 : index
    %c2 = arith.constant 2 : index
    %c0_36 = arith.constant 0 : index
    %c0_37 = arith.constant 0 : index
    %69 = vector.load %arg11[%c0_35, %c2, %c0_36, %c0_37] : memref<1x4x8x8xf32, #tpu.memory_space<vmem>>, vector<1x1x8x8xf32>
    %70 = vector.shape_cast %69 : vector<1x1x8x8xf32> to vector<8x8xf32>
    %71 = vector.shape_cast %68 : vector<8x8xf32> to vector<1x1x8x8xf32>
    tpu.vector_store %arg11[%c0_35, %c2, %c0_36, %c0_37], %71 {strides = array<i32>} : memref<1x4x8x8xf32, #tpu.memory_space<vmem>>, vector<1x1x8x8xf32>,
    %cst_38 = arith.constant dense<0.000000e+00> : vector<8x8xf32>
    %72 = tpu.matmul %68, %57, %cst_38 {dimension_numbers = #tpu.dot_dimension_numbers<[1], [0], [0], [1], [0, 0, 1, 1], [], []>} : vector<8x8xf32>, vector<8x8xf32>, vector<8x8xf32> -> vector<8x8xf32>
    %73 = vector.extract_strided_slice %8 {offsets = [0, 24], sizes = [8, 8], strides = [1, 1]} : vector<8x32xf32> to vector<8x8xf32>
    %74 = vector.extract_strided_slice %13 {offsets = [0, 24], sizes = [8, 8], strides = [1, 1]} : vector<8x32xf32> to vector<8x8xf32>
    %75 = vector.extract_strided_slice %18 {offsets = [0, 24], sizes = [8, 8], strides = [1, 1]} : vector<8x32xf32> to vector<8x8xf32>
    %cst_39 = arith.constant dense<0.000000e+00> : vector<8x8xf32>
    %76 = tpu.matmul %73, %74, %cst_39 {dimension_numbers = #tpu.dot_dimension_numbers<[1], [1], [0], [0], [0, 0, 1, 0], [], []>} : vector<8x8xf32>, vector<8x8xf32>, vector<8x8xf32> -> vector<8x8xf32>
    %cst_40 = arith.constant dense<0xFF800000> : vector<8xf32>
    %77 = vector.multi_reduction <maximumf>, %76, %cst_40 [1] : vector<8x8xf32> to vector<8xf32>
    %78 = vector.shape_cast %77 : vector<8xf32> to vector<8x1xf32>
    %79 = vector.broadcast %78 : vector<8x1xf32> to vector<8x8xf32>
    %80 = arith.subf %76, %79 : vector<8x8xf32>
    %81 = math.exp %80 : vector<8x8xf32>
    %cst_41 = arith.constant dense<0.000000e+00> : vector<8xf32>
    %82 = vector.multi_reduction <add>, %81, %cst_41 [1] : vector<8x8xf32> to vector<8xf32>
    %83 = vector.shape_cast %82 : vector<8xf32> to vector<8x1xf32>
    %84 = tpu.reciprocal %83 {approx = true} : vector<8x1xf32> -> vector<8x1xf32>
    %85 = vector.broadcast %84 : vector<8x1xf32> to vector<8x8xf32>
    %86 = arith.mulf %81, %85 : vector<8x8xf32>
    %c0_42 = arith.constant 0 : index
    %c3 = arith.constant 3 : index
    %c0_43 = arith.constant 0 : index
    %c0_44 = arith.constant 0 : index
    %87 = vector.load %arg11[%c0_42, %c3, %c0_43, %c0_44] : memref<1x4x8x8xf32, #tpu.memory_space<vmem>>, vector<1x1x8x8xf32>
    %88 = vector.shape_cast %87 : vector<1x1x8x8xf32> to vector<8x8xf32>
    %89 = vector.shape_cast %86 : vector<8x8xf32> to vector<1x1x8x8xf32>
    tpu.vector_store %arg11[%c0_42, %c3, %c0_43, %c0_44], %89 {strides = array<i32>} : memref<1x4x8x8xf32, #tpu.memory_space<vmem>>, vector<1x1x8x8xf32>,
    %cst_45 = arith.constant dense<0.000000e+00> : vector<8x8xf32>
    %90 = tpu.matmul %86, %75, %cst_45 {dimension_numbers = #tpu.dot_dimension_numbers<[1], [0], [0], [1], [0, 0, 1, 1], [], []>} : vector<8x8xf32>, vector<8x8xf32>, vector<8x8xf32> -> vector<8x8xf32>
    %91 = tpu.concatenate %36, %54, %72, %90 in 1 : vector<8x8xf32>, vector<8x8xf32>, vector<8x8xf32>, vector<8x8xf32> -> vector<8x32xf32>
    %c0_46 = arith.constant 0 : index
    %c0_47 = arith.constant 0 : index
    %92 = vector.load %arg8[%c0_46, %c0_47] : memref<32x32xf32, #tpu.memory_space<vmem>>, vector<32x32xf32>
    %cst_48 = arith.constant dense<0.000000e+00> : vector<8x32xf32>
    %93 = tpu.matmul %91, %92, %cst_48 {dimension_numbers = #tpu.dot_dimension_numbers<[1], [0], [0], [1], [0, 0, 1, 1], [], []>} : vector<8x32xf32>, vector<32x32xf32>, vector<8x32xf32> -> vector<8x32xf32>
    %c0_49 = arith.constant 0 : index
    %c0_50 = arith.constant 0 : index
    %94 = vector.load %arg9[%c0_49, %c0_50] : memref<1x32xf32, #tpu.memory_space<vmem>>, vector<1x32xf32>
    %95 = vector.broadcast %94 : vector<1x32xf32> to vector<8x32xf32>
    %96 = arith.addf %93, %95 : vector<8x32xf32>
    %c0_51 = arith.constant 0 : index
    %c0_52 = arith.constant 0 : index
    %c0_53 = arith.constant 0 : index
    %97 = vector.load %arg10[%c0_51, %c0_52, %c0_53] : memref<1x8x32xf32, #tpu.memory_space<vmem>>, vector<1x8x32xf32>
    %98 = vector.shape_cast %97 : vector<1x8x32xf32> to vector<8x32xf32>
    %99 = vector.shape_cast %96 : vector<8x32xf32> to vector<1x8x32xf32>
    tpu.vector_store %arg10[%c0_51, %c0_52, %c0_53], %99 {strides = array<i32>} : memref<1x8x32xf32, #tpu.memory_space<vmem>>, vector<1x8x32xf32>,
    return
  }
  func.func @transform_0(%arg0: i32) -> (i32, i32, i32) {
    %c0_i32 = arith.constant 0 : i32
    %c0_i32_0 = arith.constant 0 : i32
    %c0_i32_1 = arith.constant 0 : i32
    return %arg0, %c0_i32, %c0_i32_0 : i32, i32, i32
  }
  func.func @transform_1(%arg0: i32) -> (i32, i32) {
    %c0_i32 = arith.constant 0 : i32
    %c0_i32_0 = arith.constant 0 : i32
    %c0_i32_1 = arith.constant 0 : i32
    return %c0_i32, %c0_i32_0 : i32, i32
  }
  func.func @transform_2(%arg0: i32) -> (i32, i32) {
    %c0_i32 = arith.constant 0 : i32
    %c0_i32_0 = arith.constant 0 : i32
    %c0_i32_1 = arith.constant 0 : i32
    return %c0_i32, %c0_i32_0 : i32, i32
  }
  func.func @transform_3(%arg0: i32) -> (i32, i32) {
    %c0_i32 = arith.constant 0 : i32
    %c0_i32_0 = arith.constant 0 : i32
    %c0_i32_1 = arith.constant 0 : i32
    return %c0_i32, %c0_i32_0 : i32, i32
  }
  func.func @transform_4(%arg0: i32) -> (i32, i32) {
    %c0_i32 = arith.constant 0 : i32
    %c0_i32_0 = arith.constant 0 : i32
    %c0_i32_1 = arith.constant 0 : i32
    return %c0_i32, %c0_i32_0 : i32, i32
  }
  func.func @transform_5(%arg0: i32) -> (i32, i32) {
    %c0_i32 = arith.constant 0 : i32
    %c0_i32_0 = arith.constant 0 : i32
    %c0_i32_1 = arith.constant 0 : i32
    return %c0_i32, %c0_i32_0 : i32, i32
  }
  func.func @transform_6(%arg0: i32) -> (i32, i32) {
    %c0_i32 = arith.constant 0 : i32
    %c0_i32_0 = arith.constant 0 : i32
    %c0_i32_1 = arith.constant 0 : i32
    return %c0_i32, %c0_i32_0 : i32, i32
  }
  func.func @transform_7(%arg0: i32) -> (i32, i32) {
    %c0_i32 = arith.constant 0 : i32
    %c0_i32_0 = arith.constant 0 : i32
    %c0_i32_1 = arith.constant 0 : i32
    return %c0_i32, %c0_i32_0 : i32, i32
  }
  func.func @transform_8(%arg0: i32) -> (i32, i32) {
    %c0_i32 = arith.constant 0 : i32
    %c0_i32_0 = arith.constant 0 : i32
    %c0_i32_1 = arith.constant 0 : i32
    return %c0_i32, %c0_i32_0 : i32, i32
  }
  func.func @transform_9(%arg0: i32) -> (i32, i32, i32) {
    %c0_i32 = arith.constant 0 : i32
    %c0_i32_0 = arith.constant 0 : i32
    %c0_i32_1 = arith.constant 0 : i32
    return %arg0, %c0_i32, %c0_i32_0 : i32, i32, i32
  }
  func.func @transform_10(%arg0: i32) -> (i32, i32, i32, i32) {
    %c0_i32 = arith.constant 0 : i32
    %c0_i32_0 = arith.constant 0 : i32
    %c0_i32_1 = arith.constant 0 : i32
    %c0_i32_2 = arith.constant 0 : i32
    return %arg0, %c0_i32, %c0_i32_0, %c0_i32_1 : i32, i32, i32, i32
  }
}

</mosaic_0001>

<bundles_post_ra>
// kernel: tpu_custom_call.1
= control target key start
LH: loop header
LB: loop body
LE: loop exit
PB: predicated region body
PF: predicated region fallthrough
CT: control target
= control target key end

     0   :  { %s2607_s0 = inlined_call_operand.hbm [shape: f32[2,8,32], index: 0, kind: input, shape index: {}]   ;;  %s2608_s1 = inlined_call_operand.hbm [shape: f32[32,32], index: 1, kind: input, shape index: {}]   ;;  %s2609_s2 = inlined_call_operand.vmem [shape: f32[1,32], index: 2, kind: input, shape index: {}]   ;;  %s2610_s3 = inlined_call_operand.hbm [shape: f32[32,32], index: 3, kind: input, shape index: {}]   ;;  %s2611_s4 = inlined_call_operand.vmem [shape: f32[1,32], index: 4, kind: input, shape index: {}]   ;;  %s2612_s5 = inlined_call_operand.hbm [shape: f32[32,32], index: 5, kind: input, shape index: {}]   ;;  %s2613_s6 = inlined_call_operand.vmem [shape: f32[1,32], index: 6, kind: input, shape index: {}]   ;;  %s2614_s7 = inlined_call_operand.hbm [shape: f32[32,32], index: 7, kind: input, shape index: {}]   ;;  %s2615_s8 = inlined_call_operand.vmem [shape: f32[1,32], index: 8, kind: input, shape index: {}]   ;;  %s2616_s9 = inlined_call_operand.hbm [shape: f32[2,8,32], index: 9, kind: output, shape index: {0}]   ;;  %s2617_s10 = inlined_call_operand.hbm [shape: f32[2,4,8,8], index: 10, kind: output, shape index: {1}]  }
   0x1   :  { %2622 = sst [smem:[#allocation20_spill]] %s2608_s1 }
   0x2   :  { %2623 = sst [smem:[#allocation21_spill]] %s2610_s3 }
   0x3   :  { %2624 = sst [smem:[#allocation22_spill]] %s2612_s5 }
   0x4   :  { %2625 = sst [smem:[#allocation23_spill]] %s2614_s7 }
   0x5   :  { %16 = vsyncpa [#allocation3], 0 }
   0x6   :  { %18 = vsyncpa [#allocation3 + $0x1], 0 }
   0x7   :  { %19 = vsyncpa [#allocation6], 0 }
   0x8   :  { %20 = vsyncpa [#allocation9], 0 }
   0x9   :  { %21 = vsyncpa [#allocation4], 0 }
   0xa   :  { %23 = vsyncpa [#allocation4 + $0x1], 0 }
   0xb   :  { %24 = vsyncpa [#allocation13], 0 }
   0xc   :  { %26 = vsyncpa [#allocation13 + $0x1], 0  ;;  %s2230_s13 = smov 0   ;;  %s2232_s14 = smov 0  }
   0xd   :  { %s2234_s15 = smov 0   ;;  %s2236_s16 = smov 0  }
   0xe LB: > { %s2157_s17 = smov [#allocation5]   ;;  %s2251_s19 = sadd.s32 4294967295, %s2155_s16   ;;  %s2155_s16 = sphi %s2236_s16, %s2651_s16   ;;  %s2151_s15 = sphi %s2234_s15, %s2650_s15   ;;  %s2147_s14 = sphi %s2232_s14, %s2649_s14   ;;  %s2143_s13 = sphi %s2230_s13, %s2648_s13  }
   0xf   : > { %s295_s18 = sshll.u32 %s2157_s17, 4  ;;  %p1635_p0 = scmp.ge.s32.totalorder %s2155_s16, 1  ;;  %s296_s18 = int_to_ptr.vmem [resolvable:$true] %s295_s18 }
  0x10   : > { %p2618_p1 = scmp.eq.s32.totalorder %s2251_s19, 0  ;;  %p283_p2 = scmp.lt.s32.totalorder %s2155_s16, 3 }
  0x11   : > { %s2158_s21 = smov [#allocation8]   ;;  %s2159_s24 = smov [#allocation7]  }
  0x12   : > { %p2256_p3 = pnand %p1635_p0, %p283_p2  ;;  %s327_s22 = sshll.u32 %s2158_s21, 4  ;;  %s2269_s22 = int_to_ptr.vmem [resolvable:$true] %s327_s22 }
  0x13   : > { %s311_s25 = sshll.u32 %s2159_s24, 4  ;;  %s1932_s26 = scalar_lea.vmem %s296_s18, 512  ;;  %s2271_s25 = int_to_ptr.vmem [resolvable:$true] %s311_s25 }
  0x14   : > { %s2626_s20 = scalar_select %p2256_p3, 1, 0 }
  0x15   : > { %p1824_p5 = pneg %p2256_p3  ;;  %p1933_p8 = scmp.ne.s32.totalorder %s296_s18, %s1932_s26 }
  0x16   : > { %p1940_p11 = scmp.lt.s32.totalorder %s296_s18, %s296_s18  ;;  %p1941_p12 = scmp.lt.s32.totalorder %s1932_s26, %s1932_s26 }
  0x17   : > { %p2265_p6 = pnand %p1824_p5, %p2618_p1 }
  0x18   : > { %p1942_p13 = por %p1941_p12, %p1940_p11 }
  0x19   : > { %p1923_p7 = pneg %p2265_p6 }
  0x1b   : > { %p1935_p9 = pnand %p1933_p8, %p1923_p7 }
  0x1d   : > { %p1936_p10 = pneg %p1935_p9 }
  0x1f   : > { %p1943_p0 = pnand %p1942_p13, %p1936_p10 }
  0x21   : > { %1946 = shalt.err (!%p1943_p0)
}
  0x22   : > { %s2160_s27 = smov 128   ;;  %s2161_s28 = smov 8  }
  0x23   : > { %s2628_s1 = sld [smem:[#allocation20_spill]]  ;;  %s1958_s11 = scalar_lea.vmem %s2269_s22, 512 }
  0x24   : > { %p1959_p2 = scmp.ne.s32.totalorder %s2269_s22, %s1958_s11  ;;  %p1966_p9 = scmp.lt.s32.totalorder %s2269_s22, %s2269_s22 }
  0x25   : > { %p1967_p10 = scmp.lt.s32.totalorder %s1958_s11, %s1958_s11 }
  0x26   : > { %p1961_p5 = pnand %p1959_p2, %p1923_p7 }
  0x27   : > { %p1968_p11 = por %p1967_p10, %p1966_p9 }
  0x28   : > { %p1962_p8 = pneg %p1961_p5 }
  0x29   : > { %1827 = dma.hbm_to_vmem [thread:$0]  (!%p2265_p6), %s2628_s1, 512, %s296_s18, [#allocation6], %s2160_s27, %s2160_s27, %s2161_s28  }
  0x2a   : > { %p1969_p12 = pnand %p1968_p11, %p1962_p8 }
  0x2c   : > { %1972 = shalt.err (!%p1969_p12)
}
  0x2d   : > { %s2629_s5 = sld [smem:[#allocation22_spill]]  ;;  %s1984_s18 = scalar_lea.vmem %s2271_s25, 512 }
  0x2e   : > { %p1985_p13 = scmp.ne.s32.totalorder %s2271_s25, %s1984_s18  ;;  %p1992_p5 = scmp.lt.s32.totalorder %s2271_s25, %s2271_s25 }
  0x2f   : > { %p1993_p8 = scmp.lt.s32.totalorder %s1984_s18, %s1984_s18 }
  0x30   : > { %p1987_p0 = pnand %p1985_p13, %p1923_p7 }
  0x31   : > { %p1994_p9 = por %p1993_p8, %p1992_p5 }
  0x32   : > { %p1988_p2 = pneg %p1987_p0 }
  0x33   : > { %1833 = dma.hbm_to_vmem [thread:$0]  (!%p2265_p6), %s2629_s5, 512, %s2269_s22, [#allocation9], %s2160_s27, %s2160_s27, %s2161_s28  }
  0x34   : > { %p1995_p10 = pnand %p1994_p9, %p1988_p2 }
  0x36   : > { %1998 = shalt.err (!%p1995_p10)
}
  0x37   : > { %s2630_s3 = sld [smem:[#allocation21_spill]]  ;;  %s2162_s24 = smov [#allocation10]  }
  0x38   : > { %s343_s26 = sshll.u32 %s2162_s24, 4  ;;  %s344_s26 = int_to_ptr.vmem [resolvable:$true] %s343_s26 }
  0x39   : > { %s2010_s29 = scalar_lea.vmem %s344_s26, 512  ;;  %p2018_p0 = scmp.lt.s32.totalorder %s344_s26, %s344_s26 }
  0x3a   : > { %p2011_p11 = scmp.ne.s32.totalorder %s344_s26, %s2010_s29  ;;  %p2019_p2 = scmp.lt.s32.totalorder %s2010_s29, %s2010_s29 }
  0x3c   : > { %p2013_p12 = pnand %p2011_p11, %p1923_p7  ;;  %p2020_p5 = por %p2019_p2, %p2018_p0 }
  0x3d   : > { %1830 = dma.hbm_to_vmem [thread:$0]  (!%p2265_p6), %s2630_s3, 512, %s2271_s25, [#allocation6], %s2160_s27, %s2160_s27, %s2161_s28  }
  0x3e   : > { %p2014_p13 = pneg %p2013_p12 }
  0x40   : > { %p2021_p8 = pnand %p2020_p5, %p2014_p13 }
  0x42   : > { %2024 = shalt.err (!%p2021_p8)
}
  0x43   : > { %s2631_s7 = sld [smem:[#allocation23_spill]]  ;;  %s1634_s23 = sadd.s32 4294967294, %s2155_s16  }
  0x44   : > { %s2331_s11 = sadd.s32 1, %s2155_s16   ;;  %s39_s17 = sadd.s32 1, %s2151_s15 }
  0x45   : > { %s36_s12 = ssub.s32 %s2155_s16, %s2331_s11  ;;  %p46_p9 = scmp.ne.s32.totalorder %s2151_s15, %s2147_s14 }
  0x46   : > { %p37_p7 = scmp.eq.s32.totalorder %s36_s12, 0  ;;  %p47_p10 = scmp.eq.s32.totalorder %s2155_s16, 0 }
  0x47   : > { %p52_p11 = scmp.ne.s32.totalorder %s2147_s14, %s2143_s13  ;;  %p244_p13 = scmp.eq.s32.totalorder %s2251_s19, 1 }
  0x48   : > { %s2342_s18 = scalar_select %p37_p7, %s2151_s15, %s39_s17  }
  0x49   : > { %1836 = dma.hbm_to_vmem [thread:$0]  (!%p2265_p6), %s2631_s7, 512, %s344_s26, [#allocation9], %s2160_s27, %s2160_s27, %s2161_s28  }
  0x4a   : > { %2632 = sst [smem:[#allocation19_spill]] %s2342_s18  ;;  %p2344_p12 = por %p47_p10, %p46_p9 }
  0x4b   : > { %p2350_p6 = por %p2618_p1, %p52_p11  ;;  %p250_p0 = scmp.eq.s32.totalorder %s1634_s23, 1 }
  0x4c   : > { %p1852_p2 = scmp.lt.s32.totalorder %s2155_s16, 2  ;;  %s360_s28 = sand.u32 1, %s2151_s15  }
  0x4d   : > { %s2634_s27 = scalar_select %p2350_p6, 1, 0 }
  0x4e   : > { %p2357_p5 = por %p244_p13, %p46_p9  ;;  %p2361_p8 = por %p250_p0, %p52_p11 }
  0x4f   : > { %s1641_s26 = sshll.u32 %s360_s28, 3  ;;  %s1642_s29 = sshll.u32 %s2155_s16, 7 }
  0x50   : > { %s2635_s22 = scalar_select %p2357_p5, 1, 0 }
  0x51   : > { %s2636_s24 = scalar_select %p2361_p8, 1, 0 }
  0x52   : > { %s2369_s12 = scalar_lea.hbm %s2607_s0, %s1642_s29  ;;  %s364_s23 = scalar_lea.vmem [#allocation2], %s1641_s26 }
  0x53   : > { %s371_s17 = sshll.u32 %s364_s23, 4  ;;  %p2373_p7 = pnand %p1852_p2, %p2344_p12  ;;  %s372_s17 = int_to_ptr.vmem [resolvable:$true] %s371_s17 }
  0x54   : > { %s361_s3 = scalar_lea.sflag [#allocation3], %s360_s28  ;;  %s2025_s5 = scalar_lea.hbm %s2369_s12, 128 }
  0x55   : > { %p2026_p9 = scmp.ne.s32.totalorder %s2369_s12, %s2025_s5  ;;  %p2027_p10 = pneg %p2373_p7 }
  0x56   : > { %s2030_s30 = scalar_lea.hbm %s2607_s0, 256  ;;  %p2031_p0 = scmp.lt.s32.totalorder %s2369_s12, %s2607_s0 }
  0x57   : > { %p2028_p11 = pnand %p2027_p10, %p2026_p9  ;;  %p2032_p12 = scmp.lt.s32.totalorder %s2030_s30, %s2025_s5 }
  0x59   : > { %p2029_p13 = pneg %p2028_p11  ;;  %p2033_p2 = por %p2032_p12, %p2031_p0 }
  0x5b   : > { %p2034_p4 = pnand %p2033_p2, %p2029_p13 }
  0x5d   : > { %2037 = shalt.err (!%p2034_p4)
}
  0x5e   : > { %s2038_s21 = scalar_lea.vmem %s372_s17, 128  ;;  %s2163_s28 = smov [#allocation2]  }
  0x5f   : > { %p2039_p1 = scmp.ne.s32.totalorder %s372_s17, %s2038_s21  ;;  %s2043_s7 = sshll.u32 %s2163_s28, 4  ;;  %s2044_s7 = int_to_ptr.vmem [resolvable:$false] %s2043_s7 }
  0x60   : > { %s2045_s18 = scalar_lea.vmem %s2044_s7, 256  ;;  %p2046_p9 = scmp.lt.s32.totalorder %s372_s17, %s2044_s7 }
  0x61   : > { %p2041_p8 = pnand %p2039_p1, %p2027_p10  ;;  %p2047_p11 = scmp.lt.s32.totalorder %s2045_s18, %s2038_s21 }
  0x63   : > { %p2042_p5 = pneg %p2041_p8  ;;  %p2048_p6 = por %p2047_p11, %p2046_p9 }
  0x65   : > { %p2049_p3 = pnand %p2048_p6, %p2042_p5 }
  0x67   : > { %2052 = shalt.err (!%p2049_p3)
}
  0x68   : > { %1840 = dma.hbm_to_vmem [thread:$0]  (!%p2373_p7), %s2369_s12, 128, %s372_s17, %s361_s3  }
  0x69   : > { %p2638_p13 = scmp.ne.s32.totalorder %s2626_s20, 0 }
  0x6a   : > { %s2394_s5 = sand.u32 (!%p2638_p13), 1, %s2147_s14   ;;  %p2639_p1 = scmp.ne.s32.totalorder (!%p2638_p13), %s2634_s27, 0 }
  0x6b   : > { %380 = sbr.rel (%p2638_p13) target bundleno = 1923 (0x783), region = 56  ;;  %s1644_s29 = sshll.u32 (!%p2638_p13), %s2394_s5, 3 }
  0x6c   : > { %s383_s7 = scalar_lea.sflag (!%p2638_p13), [#allocation3], %s2394_s5  ;;  %s2400_s18 = scalar_lea.vmem (!%p2638_p13), [#allocation2], %s1644_s29 }
  0x70   : > { %2122 = dma.done.wait (%p2639_p1), %s383_s7, 128  }
  0x71   : > { %2124 = vsyncadd (%p2639_p1), %s383_s7, 4294967168  ;;  %p2640_p3 = scmp.eq.s32.totalorder %s2251_s19, 0 }
  0x73   : > { %2126 = dma.done.wait (%p2640_p3), [#allocation6], 1024   ;;  %p2641_p4 = pmov %p2640_p3 }
  0x74   : > { %p2642_p6 = pmov %p2640_p3 }
  0x75   : > { %2128 = vsyncadd (%p2641_p4), [#allocation6], 4294966272 }
  0x76   : > { %2130 = dma.done.wait (%p2642_p6), [#allocation9], 1024   ;;  %p2643_p5 = pmov %p2640_p3 }
  0x77   : > { %v2164_v0 = vmov 0.0   ;;  %vm2165_vm0 = vmmov 0   ;;  %v448_v1 = vld [vmem:[#allocation5 + $0x18] sm:$0xff]  ;;  %v447_v3 = vld [vmem:[#allocation5 + $0x10] sm:$0xff]  ;;  %v446_v5 = vld [vmem:[#allocation5 + $0x8] sm:$0xff]  ;;  %vm456_vm1 = vcmask 261120  }
  0x78   : > { %2132 = vsyncadd (%p2643_p5), [#allocation9], 4294966272  ;;  %1718 = vmatprep.subr.mxu0 %v2164_v0  ;;  %1729 = vmatprep.subr.mxu1 %v2164_v0  ;;  %v534_v2 = vld [vmem:[#allocation7 + $0x18] sm:$0xff]  ;;  %v533_v4 = vld [vmem:[#allocation7 + $0x10] sm:$0xff]  ;;  %vm693_vm2 = vcmask 64512   ;;  %s2166_s12 = smov 120  }
  0x79   : > { %1726 = vmatprep.mubr.msk.f32.mxu0 %vm2165_vm0, %v2164_v0  ;;  %1737 = vmatprep.mubr.msk.f32.mxu1 %vm2165_vm0, %v2164_v0  ;;  %v532_v6 = vld [vmem:[#allocation7 + $0x8] sm:$0xff]  ;;  %v445_v7 = vld [vmem:[#allocation5] sm:$0xff]  ;;  %v444_v9 = vld [vmem:[%s2400_s18] sm:$0xff]  ;;  %s2167_s17 = smov 112   ;;  %s2168_s25 = smov 104   ;;  %vm1370_vm3 = vcmask 130048  }
  0x7a   : > { %1719 = vmatpush3.msra.mxu0 %v448_v1  ;;  %1730 = vmatpush3.msra.mxu1 %v534_v2  ;;  %v531_v8 = vld [vmem:[#allocation7] sm:$0xff]  ;;  %v1651_v10 = vld [vmem:[%s2609_s2] ss:$0 sm:$0xff]  ;;  %v615_v19 = vld [vmem:[#allocation8 + $0x18] sm:$0xff]  ;;  %s1650_s23 = sshll.u32 %s2394_s5, 5  ;;  %s2169_s28 = smov 8  }
  0x7b   : > { %1720 = vmatprep.subr.mxu0 %v2164_v0  ;;  %1731 = vmatprep.subr.mxu1 %v2164_v0  ;;  %v1653_v11 = vld [vmem:[%s2611_s4] ss:$0 sm:$0xff]  ;;  %v613_v21 = vld [vmem:[#allocation8 + $0x8] sm:$0xff]  ;;  %v612_v22 = vld [vmem:[#allocation8] sm:$0xff]  ;;  %s2479_s21 = scalar_lea.vmem [#allocation12], %s1650_s23  ;;  %s2170_s7 = smov 16  }
  0x7c   : > { %1721 = vmatpush3.msra.mxu0 %v447_v3  ;;  %1732 = vmatpush3.msra.mxu1 %v533_v4  ;;  %v614_v20 = vld [vmem:[#allocation8 + $0x10] sm:$0xff]  ;;  %s2171_s18 = smov 24   ;;  %vm1372_vm4 = vcmask 195584   ;;  %s1681_s1 = sshll.u32 %s2251_s19, 9 }
  0x7d   : > { %1722 = vmatprep.subr.mxu0 %v2164_v0  ;;  %1733 = vmatprep.subr.mxu1 %v2164_v0  ;;  %v1655_v31 = vld [vmem:[%s2613_s6] ss:$0 sm:$0xff]  ;;  %s1491_s3 = sshll.u32 %s2479_s21, 4  ;;  %p2644_p7 = scmp.ne.s32.totalorder %s2635_s22, 0  ;;  %s2534_s3 = int_to_ptr.vmem [resolvable:$true] %s1491_s3 }
  0x7e   : > { %1723 = vmatpush3.msra.mxu0 %v446_v5  ;;  %1734 = vmatpush3.msra.mxu1 %v532_v6  ;;  %s2172_s30 = smov [#allocation12]  }
  0x7f   : > { %1724 = vmatprep.subr.mxu0 %v2164_v0  ;;  %1735 = vmatprep.subr.mxu1 %v2164_v0  ;;  %s2057_s26 = sshll.u32 %s2172_s30, 4  ;;  %s2058_s26 = int_to_ptr.vmem [resolvable:$false] %s2057_s26 }
  0x80   : > { %1725 = vmatpush3.msra.mxu0 %v445_v7  ;;  %1736 = vmatpush3.msra.mxu1 %v531_v8  ;;  %s2059_s23 = scalar_lea.vmem %s2058_s26, 1024  ;;  %p2060_p12 = scmp.lt.s32.totalorder %s2534_s3, %s2058_s26 }
  0x81   : > { %1727 = vmatmul.mubr.msk.f32.vlgmr.msra.gmra.mxu0 %vm456_vm1, %v444_v9  ;;  %1738 = vmatmul.mubr.msk.f32.vlgmr.msra.gmra.mxu1 %vm456_vm1, %v444_v9 }
  0x82   : > { %1751 = vmatprep.subr.mxu1 %v2164_v0  ;;  %1753 = vmatprep.mubr.msk.f32.mxu1 %vm2165_vm0, %v2164_v0 }
  0x83   : > { %1740 = vmatprep.subr.mxu0 %v2164_v0  ;;  %1748 = vmatprep.mubr.msk.f32.mxu0 %vm2165_vm0, %v2164_v0 }
  0x84   : > { %1741 = vmatpush3.msra.mxu0 %v615_v19  ;;  %v1377_v19 = vld [vmem:[#allocation10 + $0x18] sm:$0xff] }
  0x85   : > { %1742 = vmatprep.subr.mxu0 %v2164_v0 }
  0x86   : > { %1743 = vmatpush3.msra.mxu0 %v614_v20  ;;  %v1376_v20 = vld [vmem:[#allocation10 + $0x10] sm:$0xff] }
  0x87   : > { %1744 = vmatprep.subr.mxu0 %v2164_v0 }
  0x88   : > { %1745 = vmatpush3.msra.mxu0 %v613_v21  ;;  %v1375_v21 = vld [vmem:[#allocation10 + $0x8] sm:$0xff] }
  0x89   : > { %1746 = vmatprep.subr.mxu0 %v2164_v0 }
  0x8a   : > { %1747 = vmatpush3.msra.mxu0 %v612_v22  ;;  %v1374_v22 = vld [vmem:[#allocation10] sm:$0xff] }
  0x8b   : > { %1749 = vmatmul.mubr.msk.f32.vlgmr.msra.gmra.mxu0 %vm456_vm1, %v444_v9  ;;  %1771 = vmatprep.subr.mxu0 %v2164_v0 }
  0x8c   : > { %1773 = vmatprep.mubr.msk.f32.mxu0 %vm2165_vm0, %v2164_v0 }
 0x141   : > { %v526_v12 = vpop.f32.mrf.mxu0  ;;  %v608_v13 = vpop.f32.mrf.mxu1 }
 0x142   : > { %v527_v14 = vadd.f32 %v1651_v10, %v526_v12  ;;  %v609_v15 = vadd.f32 %v1653_v11, %v608_v13 }
 0x143   : > { %v1728_v16 = vpop.f32.mrf.mxu0  ;;  %v1739_v17 = vpop.f32.mrf.mxu1 }
 0x144   : > { %v530_v18 = vmul.f32 0.35355338, %v527_v14  ;;  %857 = vrot.lane.b32.xlu1 %v609_v15, %s2166_s12  ;;  %1752 = vmatpush3.xpose.msk.msra.mxu1 %vm693_vm2, %v609_v15 }
 0x145   : > { %1756 = vmatprep.subr.mxu1 %v2164_v0 }
 0x147   : > { %1754 = vmatmul.mubr.msk.f32.vlgmr.msra.gmra.mxu1 %vm693_vm2, %v530_v18 }
 0x148   : > { %855 = vrot.lane.b32.xlu1 %v530_v18, %s2166_s12  ;;  %1758 = vmatprep.mubr.msk.f32.mxu1 %vm2165_vm0, %v2164_v0 }
 0x14b   : > { %v689_v32 = vpop.f32.mrf.mxu0 }
 0x14c   : > { %1023 = vrot.lane.b32.xlu1 %v530_v18, %s2167_s17  ;;  %v2463_v33 = vadd.f32 %v1655_v31, %v689_v32 }
 0x14d   : > { %v1750_v34 = vpop.f32.mrf.mxu0 }
 0x14e   : > { %1757 = vmatpush3.msra.mxu1 %v2463_v33 }
 0x14f   : > { %1761 = vmatprep.subr.mxu1 %v2164_v0 }
 0x150   : > { %1192 = vrot.lane.b32.xlu1 %v609_v15, %s2168_s25 }
 0x154   : > { %1190 = vrot.lane.b32.xlu1 %v530_v18, %s2168_s25 }
 0x1b6   : > { %v858_v35 = vpop.permute.xlu1 %857 }
 0x1ba   : > { %v856_v36 = vpop.permute.xlu1 %855 }
 0x1be   : > { %v1024_v37 = vpop.permute.xlu1 %1023 }
 0x1c2   : > { %v1193_v40 = vpop.permute.xlu1 %1192 }
 0x1c6   : > { %v1191_v41 = vpop.permute.xlu1 %1190 }
 0x207   : > { %v766_v23 = vpop.f32.mrf.mxu1 }
 0x208   : > { %v770_v24 = vsel %vm693_vm2, %v766_v23, -inf }
 0x209   : > { %771 = vmax.xlane.f32.xlu0 %v770_v24  ;;  %v1755_v25 = vpop.f32.mrf.mxu1 }
 0x292   : > { %v772_v26 = vpop.xlane.xlu0 %771 }
 0x293   : > { %v773_v27 = vsub.f32 %v766_v23, %v772_v26 }
 0x295   : > { %v774_v28 = vmul.f32 1.442695, %v773_v27 }
 0x297   : > { %1905 = vpow2.f32 %v774_v28 }
 0x2a4   : > { %v1906_v29 = vpop.eup %1905 }
 0x2a5   : > { %v776_v30 = vsel %vm693_vm2, %v1906_v29, 0.0 }
 0x2a6   : > { %777 = vadd.xlane.f32.xlu0 %v776_v30 }
 0x2bc   : > { %1025 = vrot.lane.b32.xlu0 %v609_v15, %s2167_s17 }
 0x32f   : > { %v778_v38 = vpop.xlane.xlu0 %777 }
 0x330   : > { %1907 = vrcp.f32 %v778_v38 }
 0x333   : > { %v1026_v39 = vpop.permute.xlu0 %1025 }
 0x334   : > { %1772 = vmatpush3.xpose.msk.msra.mxu0 %vm693_vm2, %v1026_v39 }
 0x335   : > { %1781 = vmatprep.subr.mxu0 %v2164_v0 }
 0x337   : > { %1774 = vmatmul.mubr.msk.f32.vlgmr.msra.gmra.mxu0 %vm693_vm2, %v1024_v37 }
 0x338   : > { %1782 = vmatpush3.xpose.msk.msra.mxu0 %vm693_vm2, %v1193_v40  ;;  %1783 = vmatprep.mubr.msk.f32.mxu0 %vm2165_vm0, %v2164_v0 }
 0x339   : > { %1791 = vmatprep.subr.mxu0 %v2164_v0 }
 0x33b   : > { %1784 = vmatmul.mubr.msk.f32.vlgmr.msra.gmra.mxu0 %vm693_vm2, %v1191_v41 }
 0x33c   : > { %1799 = vmatprep.mubr.msk.f32.mxu0 %vm2165_vm0, %v2164_v0  ;;  %1792 = vmatpush3.msra.mxu0 %v1377_v19 }
 0x33d   : > { %v1908_v42 = vpop.eup %1907  ;;  %1793 = vmatprep.subr.mxu0 %v2164_v0 }
 0x33e   : > { %v780_v43 = vmul.f32 %v1908_v42, %v1906_v29  ;;  %1794 = vmatpush3.msra.mxu0 %v1376_v20 }
 0x33f   : > { %1795 = vmatprep.subr.mxu0 %v2164_v0 }
 0x340   : > { %781 = vst.msk [vmem:[%s2479_s21] sm:$0xff] %vm693_vm2, %v780_v43  ;;  %1759 = vmatmul.mubr.msk.f32.vlgmr.msra.gmra.mxu1 %vm693_vm2, %v780_v43  ;;  %1796 = vmatpush3.msra.mxu0 %v1375_v21 }
 0x341   : > { %1762 = vmatpush3.xpose.msk.msra.mxu1 %vm693_vm2, %v858_v35  ;;  %1763 = vmatprep.mubr.msk.f32.mxu1 %vm2165_vm0, %v2164_v0 }
 0x342   : > { %1766 = vmatprep.subr.mxu1 %v2164_v0  ;;  %1797 = vmatprep.subr.mxu0 %v2164_v0 }
 0x343   : > { %1798 = vmatpush3.msra.mxu0 %v1374_v22 }
 0x344   : > { %1764 = vmatmul.mubr.msk.f32.vlgmr.msra.gmra.mxu1 %vm693_vm2, %v856_v36 }
 0x345   : > { %1768 = vmatprep.mubr.msk.f32.mxu1 %vm2165_vm0, %v2164_v0 }
 0x3f7   : > { %v1097_v44 = vpop.f32.mrf.mxu0 }
 0x3f8   : > { %v1101_v45 = vsel %vm693_vm2, %v1097_v44, -inf }
 0x3f9   : > { %1102 = vmax.xlane.f32.xlu0 %v1101_v45  ;;  %v1775_v46 = vpop.f32.mrf.mxu0 }
 0x3fb   : > { %v1264_v47 = vpop.f32.mrf.mxu0 }
 0x3fc   : > { %v1268_v54 = vsel %vm693_vm2, %v1264_v47, -inf }
 0x3fd   : > { %v1785_v48 = vpop.f32.mrf.mxu0 }
 0x400   : > { %v2492_v49 = vpop.f32.mrf.mxu1 }
 0x402   : > { %v1760_v50 = vpop.f32.mrf.mxu1 }
 0x404   : > { %v929_v51 = vpop.f32.mrf.mxu1 }
 0x405   : > { %v933_v52 = vsel %vm693_vm2, %v929_v51, -inf }
 0x406   : > { %934 = vmax.xlane.f32.xlu1 %v933_v52  ;;  %v1765_v53 = vpop.f32.mrf.mxu1 }
 0x40a   : > { %1269 = vmax.xlane.f32.xlu1 %v1268_v54 }
 0x482   : > { %v1103_v55 = vpop.xlane.xlu0 %1102 }
 0x483   : > { %v1104_v56 = vsub.f32 %v1097_v44, %v1103_v55 }
 0x485   : > { %v1105_v57 = vmul.f32 1.442695, %v1104_v56 }
 0x487   : > { %1909 = vpow2.f32 %v1105_v57 }
 0x48f   : > { %v935_v58 = vpop.xlane.xlu1 %934 }
 0x490   : > { %v936_v3 = vsub.f32 %v929_v51, %v935_v58 }
 0x492   : > { %v937_v4 = vmul.f32 1.442695, %v936_v3 }
 0x493   : > { %v1270_v59 = vpop.xlane.xlu1 %1269 }
 0x494   : > { %v1910_v60 = vpop.eup %1909  ;;  %v1271_v61 = vsub.f32 %v1264_v47, %v1270_v59 }
 0x495   : > { %v1107_v62 = vsel %vm693_vm2, %v1910_v60, 0.0 }
 0x496   : > { %v1272_v63 = vmul.f32 1.442695, %v1271_v61  ;;  %1108 = vadd.xlane.f32.xlu0 %v1107_v62 }
 0x498   : > { %1911 = vpow2.f32 %v1272_v63 }
 0x499   : > { %1913 = vpow2.f32 %v937_v4 }
 0x4a5   : > { %v1912_v1 = vpop.eup %1911 }
 0x4a6   : > { %v1274_v2 = vsel %vm693_vm2, %v1912_v1, 0.0  ;;  %v1914_v5 = vpop.eup %1913 }
 0x4a7   : > { %1275 = vadd.xlane.f32.xlu1 %v1274_v2  ;;  %v939_v6 = vsel %vm693_vm2, %v1914_v5, 0.0 }
 0x4ac   : > { %947 = vrot.lane.b32.xlu0 %v2463_v33, %s2166_s12  ;;  %s2532_s12 = scalar_lea.hbm %s2617_s10, %s1681_s1 }
 0x4b8   : > { %1114 = vrot.lane.b32.xlu1 %v2463_v33, %s2167_s17  ;;  %s1465_s17 = scalar_lea.sflag [#allocation13], %s2394_s5 }
 0x4dc   : > { %940 = vadd.xlane.f32.xlu1 %v939_v6 }
 0x4ed   : > { %1281 = vrot.lane.b32.xlu1 %v2463_v33, %s2168_s25  ;;  %s2053_s25 = scalar_lea.vmem %s2534_s3, 512 }
 0x4ee   : > { %p2054_p8 = scmp.ne.s32.totalorder %s2534_s3, %s2053_s25  ;;  %p2061_p2 = scmp.lt.s32.totalorder %s2059_s23, %s2053_s25 }
 0x4f0   : > { %p2055_p10 = pnand %p2054_p8, %p2644_p7  ;;  %p2062_p9 = por %p2061_p2, %p2060_p12 }
 0x4f2   : > { %p2056_p0 = pneg %p2055_p10 }
 0x4f4   : > { %p2063_p11 = pnand %p2062_p9, %p2056_p0 }
 0x51f   : > { %v1109_v7 = vpop.xlane.xlu0 %1108 }
 0x520   : > { %1915 = vrcp.f32 %v1109_v7 }
 0x523   : > { %v948_v8 = vpop.permute.xlu0 %947 }
 0x524   : > { %1767 = vmatpush3.msra.mxu1 %v948_v8 }
 0x525   : > { %1776 = vmatprep.subr.mxu1 %v2164_v0 }
 0x52d   : > { %v1916_v9 = vpop.eup %1915 }
 0x52e   : > { %v1111_v10 = vmul.f32 %v1916_v9, %v1910_v60 }
 0x530   : > { %v1276_v11 = vpop.xlane.xlu1 %1275  ;;  %1666 = vst.msk [vmem:[%s2479_s21 + $0x10] sm:$0xff] %vm693_vm2, %v1111_v10 }
 0x531   : > { %1917 = vrcp.f32 %v1276_v11 }
 0x534   : > { %v1115_v14 = vpop.permute.xlu1 %1114 }
 0x53e   : > { %v1918_v12 = vpop.eup %1917 }
 0x53f   : > { %v1278_v13 = vmul.f32 %v1918_v12, %v1912_v1 }
 0x541   : > { %1670 = vst.msk [vmem:[%s2479_s21 + $0x18] sm:$0xff] %vm693_vm2, %v1278_v13 }
 0x565   : > { %v941_v15 = vpop.xlane.xlu1 %940 }
 0x566   : > { %1919 = vrcp.f32 %v941_v15 }
 0x569   : > { %v1282_v18 = vpop.permute.xlu1 %1281 }
 0x573   : > { %v1920_v16 = vpop.eup %1919 }
 0x574   : > { %v943_v17 = vmul.f32 %v1920_v16, %v1914_v5 }
 0x576   : > { %1662 = vst.msk [vmem:[%s2479_s21 + $0x8] sm:$0xff] %vm693_vm2, %v943_v17  ;;  %1769 = vmatmul.mubr.msk.f32.vlgmr.msra.gmra.mxu1 %vm693_vm2, %v943_v17 }
 0x577   : > { %1777 = vmatpush3.msra.mxu1 %v1115_v14  ;;  %1778 = vmatprep.mubr.msk.f32.mxu1 %vm2165_vm0, %v2164_v0 }
 0x578   : > { %1786 = vmatprep.subr.mxu1 %v2164_v0 }
 0x57a   : > { %1779 = vmatmul.mubr.msk.f32.vlgmr.msra.gmra.mxu1 %vm693_vm2, %v1111_v10 }
 0x57b   : > { %1787 = vmatpush3.msra.mxu1 %v1282_v18  ;;  %1788 = vmatprep.mubr.msk.f32.mxu1 %vm2165_vm0, %v2164_v0 }
 0x57e   : > { %1789 = vmatmul.mubr.msk.f32.vlgmr.msra.gmra.mxu1 %vm693_vm2, %v1278_v13 }
 0x636   : > { %v1019_v23 = vpop.f32.mrf.mxu1 }
 0x637   : > { %1358 = vrot.lane.b32.xlu0 %v1019_v23, %s2169_s28 }
 0x638   : > { %v1770_v24 = vpop.f32.mrf.mxu1 }
 0x63a   : > { %v1186_v25 = vpop.f32.mrf.mxu1 }
 0x63b   : > { %1362 = vrot.lane.b32.xlu1 %v1186_v25, %s2170_s7 }
 0x63c   : > { %v1780_v26 = vpop.f32.mrf.mxu1 }
 0x63e   : > { %v1353_v27 = vpop.f32.mrf.mxu1 }
 0x63f   : > { %1366 = vrot.lane.b32.xlu0 %v1353_v27, %s2171_s18 }
 0x640   : > { %v1790_v28 = vpop.f32.mrf.mxu1 }
 0x6a9   : > { %v1359_v29 = vpop.permute.xlu0 %1358 }
 0x6aa   : > { %v1369_v30 = vsel %vm693_vm2, %v2492_v49, %v1359_v29 }
 0x6ad   : > { %v1363_v0 = vpop.permute.xlu1 %1362 }
 0x6ae   : > { %v1371_v31 = vsel %vm1370_vm3, %v1369_v30, %v1363_v0 }
 0x6b1   : > { %v1367_v32 = vpop.permute.xlu0 %1366 }
 0x6b2   : > { %v1373_v33 = vsel %vm1372_vm4, %v1371_v31, %v1367_v32 }
 0x6b3   : > { %1800 = vmatmul.mubr.msk.f32.vlgmr.msra.gmra.mxu0 %vm456_vm1, %v1373_v33 }
 0x6b4   : > { %2066 = shalt.err (!%p2063_p11)
}
 0x6b5   : > { %s2067_s21 = scalar_lea.hbm %s2532_s12, 512  ;;  %s2071_s1 = scalar_lea.hbm %s2617_s10, 1024 }
 0x6b6   : > { %p2068_p13 = scmp.ne.s32.totalorder %s2532_s12, %s2067_s21  ;;  %p2072_p4 = scmp.lt.s32.totalorder %s2532_s12, %s2617_s10 }
 0x6b7   : > { %p2073_p6 = scmp.lt.s32.totalorder %s2071_s1, %s2067_s21 }
 0x6b8   : > { %p2069_p1 = pnand %p2068_p13, %p2644_p7 }
 0x6b9   : > { %p2074_p5 = por %p2073_p6, %p2072_p4 }
 0x6ba   : > { %p2070_p3 = pneg %p2069_p1 }
 0x6bc   : > { %p2075_p8 = pnand %p2074_p5, %p2070_p3 }
 0x6be   : > { %2078 = shalt.err (!%p2075_p8)
}
 0x6bf   : > { %s2173_s25 = smov 128   ;;  %v1672_v34 = vld [vmem:[%s2615_s8] ss:$0 sm:$0xff]  ;;  %s1676_s23 = sshll.u32 %s2251_s19, 7 }
 0x6c0   : > { %1821 = dma.vmem_to_hbm [thread:$0]  (%p2644_p7), %s2534_s3, 512, %s2532_s12, %s1465_s17, %s2173_s25, %s2173_s25, %s2169_s28  }
 0x6c1   : > { %s436_s21 = scalar_lea.vmem [#allocation11], %s1644_s29  ;;  %s2569_s20 = scalar_lea.hbm %s2616_s9, %s1676_s23 }
 0x6c2   : > { %s1478_s7 = sshll.u32 %s436_s21, 4  ;;  %s1460_s28 = scalar_lea.sflag [#allocation4], %s2394_s5  ;;  %s1479_s7 = int_to_ptr.vmem [resolvable:$true] %s1478_s7 }
 0x6c3   : > { %s2079_s3 = scalar_lea.vmem %s1479_s7, 128  ;;  %s2174_s19 = smov [#allocation11]  }
 0x6c4   : > { %p2080_p10 = scmp.ne.s32.totalorder %s1479_s7, %s2079_s3  ;;  %s2083_s29 = sshll.u32 %s2174_s19, 4  ;;  %s2084_s29 = int_to_ptr.vmem [resolvable:$false] %s2083_s29 }
 0x6c5   : > { %s2085_s12 = scalar_lea.vmem %s2084_s29, 256  ;;  %p2086_p2 = scmp.lt.s32.totalorder %s1479_s7, %s2084_s29 }
 0x6c6   : > { %p2081_p0 = pnand %p2080_p10, %p2644_p7  ;;  %p2087_p9 = scmp.lt.s32.totalorder %s2085_s12, %s2079_s3 }
 0x6c8   : > { %p2082_p12 = pneg %p2081_p0  ;;  %p2088_p11 = por %p2087_p9, %p2086_p2 }
 0x6ca   : > { %p2089_p13 = pnand %p2088_p11, %p2082_p12 }
 0x773   : > { %v1454_v35 = vpop.f32.mrf.mxu0 }
 0x774   : > { %v1455_v36 = vadd.f32 %v1672_v34, %v1454_v35 }
 0x775   : > { %v1801_v37 = vpop.f32.mrf.mxu0 }
 0x776   : > { %1458 = vst.msk [vmem:[%s436_s21] sm:$0xff] %vm456_vm1, %v1455_v36 }
 0x777   : > { %2092 = shalt.err (!%p2089_p13)
}
 0x778   : > { %s2093_s17 = scalar_lea.hbm %s2569_s20, 128  ;;  %s2097_s25 = scalar_lea.hbm %s2616_s9, 256 }
 0x779   : > { %p2094_p1 = scmp.ne.s32.totalorder %s2569_s20, %s2093_s17  ;;  %p2098_p6 = scmp.lt.s32.totalorder %s2569_s20, %s2616_s9 }
 0x77a   : > { %p2099_p5 = scmp.lt.s32.totalorder %s2097_s25, %s2093_s17 }
 0x77b   : > { %p2095_p3 = pnand %p2094_p1, %p2644_p7 }
 0x77c   : > { %p2100_p8 = por %p2099_p5, %p2098_p6 }
 0x77d   : > { %p2096_p4 = pneg %p2095_p3 }
 0x77f   : > { %p2101_p10 = pnand %p2100_p8, %p2096_p4 }
 0x781   : > { %2104 = shalt.err (!%p2101_p10)
}
 0x782   : > { %1820 = dma.vmem_to_hbm [thread:$0]  (%p2644_p7), %s1479_s7, 128, %s2569_s20, %s1460_s28  }
 0x783 PF: > { %s1506_s23 = sand.u32 1, %s2143_s13   ;;  %p2645_p0 = scmp.ne.s32.totalorder %s2636_s24, 0 }
 0x784   : > { %p2646_p12 = scmp.ge.s32.totalorder %s2155_s16, 2  ;;  %s1507_s21 = scalar_lea.sflag [#allocation4], %s1506_s23 }
 0x786   : > { %p1842_p2 = pnand %p2646_p12, %p2645_p0 }
 0x788   : > { %p1843_p9 = pneg %p1842_p2 }
 0x78a   : > { %2134 = dma.done.wait (%p1843_p9), %s1507_s21, 128  }
 0x78b   : > { %2136 = vsyncadd (%p1843_p9), %s1507_s21, 4294967168  ;;  %s1516_s18 = scalar_lea.sflag [#allocation13], %s1506_s23 }
 0x78c   : > { %2138 = dma.done.wait (%p1843_p9), %s1516_s18, 512  }
 0x78d   : > { %2140 = vsyncadd (%p1843_p9), %s1516_s18, 4294966784  ;;  %s2647_s22 = sld [smem:[#allocation19_spill]]  ;;  %p29_p7 = scmp.ge.s32.totalorder %s2331_s11, 4  }
 0x78e   : > { %s2648_s13 = smov %s2147_s14  ;;  %s2649_s14 = smov %s2151_s15 }
 0x78f   : > { %s2651_s16 = smov %s2331_s11  ;;  %31 = sbr.rel (!%p29_p7) target bundleno = 14 (0xe), region = 137 }
 0x793   : > { %s2650_s15 = smov %s2647_s22 }
 0x794   :  { %1521 = vsyncpa [#allocation3], 1 }
 0x795   :  { %1523 = vsyncpa [#allocation3 + $0x1], 1 }
 0x796   :  { %1524 = vsyncpa [#allocation6], 1 }
 0x797   :  { %1525 = vsyncpa [#allocation9], 1 }
 0x798   :  { %1526 = vsyncpa [#allocation4], 1 }
 0x799   :  { %1528 = vsyncpa [#allocation4 + $0x1], 1 }
 0x79a   :  { %1529 = vsyncpa [#allocation13], 1 }
 0x79b   :  { %1531 = vsyncpa [#allocation13 + $0x1], 1 }

</bundles_post_ra>
